<compile_context>
chip_gen: v5e
topology: v5e:2x2
jax: 0.10.0
libtpu: 0.0.40
codegen_flags: <defaults>
</compile_context>

<pallas_src>
import functools

import jax
import jax.numpy as jnp
from jax.experimental import pallas as pl
from jax.experimental.pallas import tpu as pltpu


def _round_up(x, m):
    return ((x + m - 1) // m) * m


def _pick_tile(total, target, quantum):
    """Largest multiple of `quantum` <= min(target, total) that divides `total`.

    `total` is already a multiple of `quantum`, so this always terminates.
    """
    t = max(quantum, min(target, total))
    t = (t // quantum) * quantum
    while total % t != 0:
        t -= quantum
    return t


def _vmem_limit_bytes():
    cap = 64 * 1024 * 1024          # conservative fallback (v7x per-TC VMEM)
    try:
        info = pltpu.get_tpu_info()
        cap = getattr(info, "vmem_capacity_bytes", cap) or cap
    except Exception:
        pass
    # ~75% of physical VMEM: ~48 MiB on v7x (64 MiB), ~96 MiB on v5e/v6e (128 MiB).
    return min(int(cap * 3 // 4), 100 * 1024 * 1024)


# ---------------------------------------------------------------------------
# Stage 1: feature projection  XW = X @ W^T   (W passed pre-transposed [F, Cpad])
# ---------------------------------------------------------------------------
def _proj_kernel(x_ref, wt_ref, o_ref):
    o_ref[...] = jnp.dot(
        x_ref[...], wt_ref[...], preferred_element_type=jnp.float32
    ).astype(o_ref.dtype)


# ---------------------------------------------------------------------------
# Stage 2: propagation + bias + optional (masked) LayerNorm
#   acc += P[i,k] @ XW[k];  at last k:  z = acc + b;  LN over first c_real lanes
# ---------------------------------------------------------------------------
def _prop_kernel(p_ref, xw_ref, b_ref, g_ref, be_ref, m_ref, o_ref, acc_ref, *,
                 c_real, norm, tk_eff, xw_resident):
    k = pl.program_id(1)

    @pl.when(k == 0)
    def _():
        acc_ref[...] = jnp.zeros_like(acc_ref)

    if xw_resident:
        # Full XW panel lives in VMEM (loaded once); slice the k-th chunk.
        start = pl.multiple_of(k * tk_eff, 128)
        xw = xw_ref[pl.ds(start, tk_eff), :]
    else:
        xw = xw_ref[...]

    acc_ref[...] += jnp.dot(p_ref[...], xw, preferred_element_type=jnp.float32)

    @pl.when(k == pl.num_programs(1) - 1)
    def _():
        z = acc_ref[...] + b_ref[...]
        if norm == "ln":
            # LayerNorm over the real n_classes lanes only (Cpad >= c_real);
            # mask precomputed wrapper-side.
            mask = m_ref[...]
            inv_c = jnp.float32(1.0 / c_real)
            mean = jnp.sum(z * mask, axis=-1, keepdims=True) * inv_c
            zc = (z - mean) * mask
            var = jnp.sum(zc * zc, axis=-1, keepdims=True) * inv_c
            z = zc * jax.lax.rsqrt(var + 1e-5) * g_ref[...] + be_ref[...]
        o_ref[...] = z.astype(o_ref.dtype)


# ---------------------------------------------------------------------------
# One-time cache-side preparation of P^K (pad + cast).  Call ONCE, reuse.
# ---------------------------------------------------------------------------
def prepare_precompute(precompute, dtype=jnp.bfloat16):
    """Pad P^K to (round_up(N,8), round_up(N,128)) and cast for the MXU."""
    N = precompute.shape[0]
    n_rows = _round_up(N, 8)
    n_k = _round_up(N, 128)
    p = jnp.zeros((n_rows, n_k), dtype).at[:N, :N].set(precompute.astype(dtype))
    return p, N


# ---------------------------------------------------------------------------
# Wrapper
# ---------------------------------------------------------------------------
def dgc_forward(precompute, feat, w, b, gamma=None, beta=None, norm=None, *,
                n_real=None, compute_dtype=jnp.bfloat16, tm=512, tk=1024,
                xw_resident=None):
    """Fused DGC forward: (P @ (X @ W^T)) + b, optional LayerNorm over classes.

    If `n_real` is given, `precompute` must already be the padded/cast array from
    prepare_precompute() (the cached, zero-extra-HBM path).  Otherwise the raw
    [N, N] P is padded here (convenience / testing path).
    """
    if norm not in (None, "ln"):
        raise NotImplementedError(
            "DGC Pallas forward: only norm=None or norm='ln' is implemented")
    C, F = w.shape

    if n_real is None:
        n_real = precompute.shape[0]
        p_pad, _ = prepare_precompute(precompute, compute_dtype)
    else:
        p_pad = precompute.astype(compute_dtype)   # no-op if already prepared
    N = n_real
    n_rows, n_k = p_pad.shape
    assert n_rows == _round_up(N, 8) and n_k == _round_up(N, 128)
    assert feat.shape == (N, F)

    c_pad = _round_up(C, 128)                      # lane-dense output / MXU columns

    # ---- tiles are divisors of the (finely) padded sizes -------------------
    # Cap the row tile so the "parallel" axis has >=2 tiles (both v7x TCs busy).
    tm_target = tm if n_rows < 16 else min(tm, n_rows // 2)
    tm_eff = _pick_tile(n_rows, tm_target, 8)
    tk_eff = _pick_tile(n_k, tk, 128)

    vmem_limit = _vmem_limit_bytes()
    xw_bytes = n_k * c_pad * jnp.dtype(compute_dtype).itemsize
    if xw_resident is None:
        # Leave ~2/3 of the VMEM budget for P double buffers, accumulator, output.
        xw_resident = xw_bytes <= vmem_limit // 3

    # ---- small wrapper-side layout plumbing (cheap, O(N*F) / O(F*C)) -------
    x_pad = jnp.zeros((n_k, F), compute_dtype).at[:N, :].set(
        feat.astype(compute_dtype))
    wt_pad = jnp.zeros((F, c_pad), compute_dtype).at[:, :C].set(
        w.T.astype(compute_dtype))                 # pre-transposed: no in-kernel .T
    b_pad = jnp.zeros((1, c_pad), jnp.float32).at[:, :C].set(
        b.reshape(1, C).astype(jnp.float32))
    if norm == "ln":
        g_pad = jnp.zeros((1, c_pad), jnp.float32).at[:, :C].set(
            gamma.reshape(1, C).astype(jnp.float32))
        be_pad = jnp.zeros((1, c_pad), jnp.float32).at[:, :C].set(
            beta.reshape(1, C).astype(jnp.float32))
    else:
        g_pad = jnp.ones((1, c_pad), jnp.float32)
        be_pad = jnp.zeros((1, c_pad), jnp.float32)
    m_pad = jnp.zeros((1, c_pad), jnp.float32).at[:, :C].set(1.0)  # LN lane mask

    # ---- Stage 1: XW = X @ W^T  -> [n_k, c_pad] ----------------------------
    ts1 = _pick_tile(n_k, max(tk, 512), 128)
    xw = pl.pallas_call(
        _proj_kernel,
        out_shape=jax.ShapeDtypeStruct((n_k, c_pad), compute_dtype),
        grid=(n_k // ts1,),
        in_specs=[
            pl.BlockSpec((ts1, F), lambda i: (i, 0)),
            pl.BlockSpec((F, c_pad), lambda i: (0, 0)),
        ],
        out_specs=pl.BlockSpec((ts1, c_pad), lambda i: (i, 0)),
        compiler_params=pltpu.CompilerParams(
            dimension_semantics=("parallel",)),
    )(x_pad, wt_pad)

    # ---- Stage 2: out = P @ XW + b  (+ LayerNorm) --------------------------
    if xw_resident:
        # Full-array block, constant block index -> DMA'd into VMEM exactly once.
        xw_spec = pl.BlockSpec((n_k, c_pad), lambda i, k: (0, 0))
    else:
        xw_spec = pl.BlockSpec((tk_eff, c_pad), lambda i, k: (k, 0))

    kernel = functools.partial(_prop_kernel, c_real=C, norm=norm,
                               tk_eff=tk_eff, xw_resident=xw_resident)
    out_pad = pl.pallas_call(
        kernel,
        out_shape=jax.ShapeDtypeStruct((n_rows, c_pad), jnp.float32),
        grid=(n_rows // tm_eff, n_k // tk_eff),
        in_specs=[
            pl.BlockSpec((tm_eff, tk_eff), lambda i, k: (i, k)),   # P tile (streamed)
            xw_spec,                                               # XW panel
            pl.BlockSpec((1, c_pad), lambda i, k: (0, 0)),         # bias
            pl.BlockSpec((1, c_pad), lambda i, k: (0, 0)),         # gamma
            pl.BlockSpec((1, c_pad), lambda i, k: (0, 0)),         # beta
            pl.BlockSpec((1, c_pad), lambda i, k: (0, 0)),         # LN lane mask
        ],
        out_specs=pl.BlockSpec((tm_eff, c_pad), lambda i, k: (i, 0)),
        scratch_shapes=[pltpu.VMEM((tm_eff, c_pad), jnp.float32)],
        compiler_params=pltpu.CompilerParams(
            dimension_semantics=("parallel", "arbitrary"),
            vmem_limit_bytes=vmem_limit),
    )(p_pad, xw, b_pad, g_pad, be_pad, m_pad)

    return out_pad[:N, :C]


# ---------------------------------------------------------------------------
# One-time cached preprocessing (plain-JAX glue; matches DGC precompute)
# ---------------------------------------------------------------------------
def build_precompute(adj, K, T):
    N = adj.shape[0]
    delta = T / K
    a_tilde = adj + jnp.eye(N, dtype=adj.dtype)                 # A + I
    deg = jnp.sum(a_tilde, axis=1)
    d_inv_sqrt = 1.0 / jnp.sqrt(deg)
    S = a_tilde * d_inv_sqrt[:, None] * d_inv_sqrt[None, :]     # D^-1/2 (A+I) D^-1/2
    P = (1.0 - delta) * jnp.eye(N, dtype=adj.dtype) + delta * S
    out = jnp.eye(N, dtype=adj.dtype)
    for _ in range(K):                                          # mulAdj: P^K
        out = out @ P
    return out


def _reference(precompute, feat, w, b, gamma, beta, norm):
    h = precompute @ feat
    h = h @ w.T + b
    if norm == "ln":
        mean = jnp.mean(h, axis=-1, keepdims=True)
        var = jnp.mean((h - mean) ** 2, axis=-1, keepdims=True)
        h = (h - mean) * jax.lax.rsqrt(var + 1e-5) * gamma + beta
    return h


def _make_case(key, N, F, C, K, T):
    k_adj, k_feat, k_w = jax.random.split(key, 3)
    a = (jax.random.uniform(k_adj, (N, N)) > 0.6).astype(jnp.float32)
    adj = jnp.clip(a + a.T, 0.0, 1.0) * (1.0 - jnp.eye(N, dtype=jnp.float32))
    feat = jax.random.normal(k_feat, (N, F), dtype=jnp.float32)
    limit = jnp.sqrt(6.0 / (F + C))
    w = jax.random.uniform(k_w, (C, F), minval=-limit, maxval=limit,
                           dtype=jnp.float32)
    b = jnp.zeros((C,), dtype=jnp.float32)
    gamma = jnp.ones((C,), dtype=jnp.float32)
    beta = jnp.zeros((C,), dtype=jnp.float32)
    precompute = build_precompute(adj, K, T)
    return precompute, feat, w, b, gamma, beta


if __name__ == "__main__":
    key = jax.random.PRNGKey(0)
    k1, k2 = jax.random.split(key, 2)

    # ---- case 1: tiny (single-tile grid), f32 compute, 'ln' and no-norm -----
    P1, X1, W1, B1, G1, BE1 = _make_case(k1, N=8, F=32, C=16, K=2, T=2.0)
    out1 = jax.block_until_ready(
        dgc_forward(P1, X1, W1, B1, G1, BE1, norm="ln",
                    compute_dtype=jnp.float32))
    ref1 = _reference(P1, X1, W1, B1, G1, BE1, norm="ln")
    assert out1.shape == (8, 16)
    assert jnp.allclose(out1, ref1, atol=1e-4, rtol=1e-4)

    out1b = jax.block_until_ready(
        dgc_forward(P1, X1, W1, B1, norm=None, compute_dtype=jnp.float32))
    ref1b = _reference(P1, X1, W1, B1, G1, BE1, norm=None)
    assert jnp.allclose(out1b, ref1b, atol=1e-4, rtol=1e-4)

    # ---- case 2: multi-tile grid, cached/prepared bf16 P (default path) -----
    P2, X2, W2, B2, G2, BE2 = _make_case(k2, N=640, F=48, C=24, K=3, T=3.0)
    ref2 = _reference(P2, X2, W2, B2, G2, BE2, norm="ln")

    P2_prep, N2 = prepare_precompute(P2, jnp.bfloat16)    # one-time, cache-side
    out2 = jax.block_until_ready(
        dgc_forward(P2_prep, X2, W2, B2, G2, BE2, norm="ln", n_real=N2))
    assert out2.shape == (640, 24)
    assert jnp.allclose(out2, ref2, atol=1e-1, rtol=1e-1)

    # same data, streaming-XW path forced (exercises the non-resident BlockSpec)
    out2s = jax.block_until_ready(
        dgc_forward(P2_prep, X2, W2, B2, G2, BE2, norm="ln", n_real=N2,
                    xw_resident=False))
    assert jnp.allclose(out2s, ref2, atol=1e-1, rtol=1e-1)

    # f32 escape hatch (raw un-prepared P), tight tolerance
    out2f = jax.block_until_ready(
        dgc_forward(P2, X2, W2, B2, G2, BE2, norm="ln",
                    compute_dtype=jnp.float32))
    assert jnp.allclose(out2f, ref2, atol=1e-3, rtol=1e-3)

    print("KERNEL_OK")
</pallas_src>

<mosaic_0001>
module attributes {stable_mosaic.version = 11 : i64} {
  func.func @_proj_kernel(%arg0: i32, %arg1: memref<128x32xf32, #tpu.memory_space<vmem>>, %arg2: memref<32x128xf32, #tpu.memory_space<vmem>>, %arg3: memref<128x128xf32, #tpu.memory_space<vmem>>) attributes {dimension_semantics = [#tpu.dimension_semantics<parallel>], iteration_bounds = array<i64: 1>, scalar_prefetch = 0 : i64, scratch_operands = 0 : i64, tpu.core_type = #tpu.core_type<tc>, window_params = [{transform_indices = @transform_0, window_bounds = array<i64: 128, 32>}, {pipeline_mode = #tpu.pipeline_mode<synchronous>, transform_indices = @transform_1, window_bounds = array<i64: 32, 128>}, {transform_indices = @transform_2, window_bounds = array<i64: 128, 128>}]} {
    %c0 = arith.constant 0 : index
    %c0_0 = arith.constant 0 : index
    %0 = vector.load %arg1[%c0, %c0_0] : memref<128x32xf32, #tpu.memory_space<vmem>>, vector<128x32xf32>
    %c0_1 = arith.constant 0 : index
    %c0_2 = arith.constant 0 : index
    %1 = vector.load %arg2[%c0_1, %c0_2] : memref<32x128xf32, #tpu.memory_space<vmem>>, vector<32x128xf32>
    %cst = arith.constant dense<0.000000e+00> : vector<128x128xf32>
    %2 = tpu.matmul %0, %1, %cst {dimension_numbers = #tpu.dot_dimension_numbers<[1], [0], [0], [1], [0, 0, 1, 1], [], []>} : vector<128x32xf32>, vector<32x128xf32>, vector<128x128xf32> -> vector<128x128xf32>
    %c0_3 = arith.constant 0 : index
    %c0_4 = arith.constant 0 : index
    %3 = vector.load %arg3[%c0_3, %c0_4] : memref<128x128xf32, #tpu.memory_space<vmem>>, vector<128x128xf32>
    tpu.vector_store %arg3[%c0_3, %c0_4], %2 {strides = array<i32>} : memref<128x128xf32, #tpu.memory_space<vmem>>, vector<128x128xf32>,
    return
  }
  func.func @transform_0(%arg0: i32) -> (i32, i32) {
    %c0_i32 = arith.constant 0 : i32
    %c0_i32_0 = arith.constant 0 : i32
    return %arg0, %c0_i32 : i32, i32
  }
  func.func @transform_1(%arg0: i32) -> (i32, i32) {
    %c0_i32 = arith.constant 0 : i32
    %c0_i32_0 = arith.constant 0 : i32
    %c0_i32_1 = arith.constant 0 : i32
    return %c0_i32, %c0_i32_0 : i32, i32
  }
  func.func @transform_2(%arg0: i32) -> (i32, i32) {
    %c0_i32 = arith.constant 0 : i32
    %c0_i32_0 = arith.constant 0 : i32
    return %arg0, %c0_i32 : i32, i32
  }
}

</mosaic_0001>

<bundles_post_ra>
// kernel: tpu_custom_call.1
= control target key start
LH: loop header
LB: loop body
LE: loop exit
PB: predicated region body
PF: predicated region fallthrough
CT: control target
= control target key end

     0   :  { %vm32_vm0 = vcmask 261120   ;;  %s334_s0 = inlined_call_operand.vmem [shape: f32[128,32], index: 0, kind: input, shape index: {}]   ;;  %s335_s1 = inlined_call_operand.vmem [shape: f32[32,128], index: 1, kind: input, shape index: {}]   ;;  %s336_s2 = inlined_call_operand.hbm [shape: f32[128,128], index: 2, kind: output, shape index: {}]  }
   0x1   :  { %v31_v0 = vld [vmem:[%s335_s1 + $0x18] sm:$0xff]  ;;  %v30_v1 = vld [vmem:[%s335_s1 + $0x10] sm:$0xff]  ;;  %v29_v2 = vld [vmem:[%s335_s1 + $0x8] sm:$0xff] }
   0x2   :  { %197 = vmatpush.msra.mxu2 %v31_v0  ;;  %198 = vmatpush.msra.mxu3 %v31_v0  ;;  %v28_v3 = vld [vmem:[%s335_s1] sm:$0xff] }
   0x3   :  { %93 = vmatpush.msra.mxu0 %v31_v0  ;;  %196 = vmatpush.msra.mxu1 %v31_v0  ;;  %v20_v4 = vld [vmem:[%s334_s0 + $0x40] sm:$0xff] }
   0x4   :  { %200 = vmatpush.msra.mxu2 %v30_v1  ;;  %201 = vmatpush.msra.mxu3 %v30_v1  ;;  %v24_v5 = vld [vmem:[%s334_s0 + $0x60] sm:$0xff] }
   0x5   :  { %94 = vmatpush.msra.mxu0 %v30_v1  ;;  %199 = vmatpush.msra.mxu1 %v30_v1 }
   0x6   :  { %203 = vmatpush.msra.mxu2 %v29_v2  ;;  %204 = vmatpush.msra.mxu3 %v29_v2 }
   0x7   :  { %95 = vmatpush.msra.mxu0 %v29_v2  ;;  %202 = vmatpush.msra.mxu1 %v29_v2 }
   0x8   :  { %7 = vsyncpa [#allocation3], 0  ;;  %206 = vmatpush.msra.mxu2 %v28_v3  ;;  %207 = vmatpush.msra.mxu3 %v28_v3  ;;  %v12_v6 = vld [vmem:[%s334_s0] sm:$0xff]  ;;  %v21_v8 = vld [vmem:[%s334_s0 + $0x48] sm:$0xff]  ;;  %s168_s22 = sshll.u32 %s336_s2, 4  ;;  %s238_s23 = smov 128   ;;  %s169_s22 = int_to_ptr.hbm [resolvable:$true] %s168_s22 }
   0x9   :  { %v16_v7 = vld [vmem:[%s334_s0 + $0x20] sm:$0xff]  ;;  %188 = vmatmul.msk.f32.vlgmr.msra.gmra.mxu2 %vm32_vm0, %v20_v4  ;;  %192 = vmatmul.msk.f32.vlgmr.msra.gmra.mxu3 %vm32_vm0, %v24_v5  ;;  %v25_v9 = vld [vmem:[%s334_s0 + $0x68] sm:$0xff]  ;;  %v22_v12 = vld [vmem:[%s334_s0 + $0x50] sm:$0xff]  ;;  %s239_s24 = smov 8  }
   0xa   :  { %96 = vmatpush.msra.mxu0 %v28_v3  ;;  %205 = vmatpush.msra.mxu1 %v28_v3  ;;  %v13_v10 = vld [vmem:[%s334_s0 + $0x8] sm:$0xff]  ;;  %v26_v13 = vld [vmem:[%s334_s0 + $0x70] sm:$0xff]  ;;  %v23_v16 = vld [vmem:[%s334_s0 + $0x58] sm:$0xff] }
   0xb   :  { %180 = vmatmul.msk.f32.vlgmr.msra.gmra.mxu0 %vm32_vm0, %v12_v6  ;;  %184 = vmatmul.msk.f32.vlgmr.msra.gmra.mxu1 %vm32_vm0, %v16_v7  ;;  %v17_v11 = vld [vmem:[%s334_s0 + $0x28] sm:$0xff]  ;;  %v14_v14 = vld [vmem:[%s334_s0 + $0x10] sm:$0xff]  ;;  %v27_v17 = vld [vmem:[%s334_s0 + $0x78] sm:$0xff] }
   0xc   :  { %v18_v15 = vld [vmem:[%s334_s0 + $0x30] sm:$0xff]  ;;  %v15_v18 = vld [vmem:[%s334_s0 + $0x18] sm:$0xff] }
   0xd   :  { %v19_v19 = vld [vmem:[%s334_s0 + $0x38] sm:$0xff]  ;;  %s237_s0 = smov [#allocation2]  }
   0xe   :  { %s166_s20 = sshll.u32 %s237_s0, 4  ;;  %s167_s20 = int_to_ptr.vmem [resolvable:$true] %s166_s20 }
  0x11   :  { %189 = vmatmul.msk.f32.gmra.mxu2 %vm32_vm0, %v21_v8  ;;  %193 = vmatmul.msk.f32.gmra.mxu3 %vm32_vm0, %v25_v9 }
  0x13   :  { %181 = vmatmul.msk.f32.gmra.mxu0 %vm32_vm0, %v13_v10  ;;  %185 = vmatmul.msk.f32.gmra.mxu1 %vm32_vm0, %v17_v11 }
  0x19   :  { %190 = vmatmul.msk.f32.gmra.mxu2 %vm32_vm0, %v22_v12  ;;  %194 = vmatmul.msk.f32.gmra.mxu3 %vm32_vm0, %v26_v13 }
  0x1b   :  { %182 = vmatmul.msk.f32.gmra.mxu0 %vm32_vm0, %v14_v14  ;;  %186 = vmatmul.msk.f32.gmra.mxu1 %vm32_vm0, %v18_v15 }
  0x21   :  { %191 = vmatmul.msk.f32.gmra.mxu2 %vm32_vm0, %v23_v16  ;;  %195 = vmatmul.msk.f32.gmra.mxu3 %vm32_vm0, %v27_v17 }
  0x23   :  { %183 = vmatmul.msk.f32.gmra.mxu0 %vm32_vm0, %v15_v18  ;;  %187 = vmatmul.msk.f32.gmra.mxu1 %vm32_vm0, %v19_v19 }
  0x88   :  { %v98_v20 = vpop.f32.mrf.mxu0  ;;  %v110_v21 = vpop.f32.mrf.mxu1 }
  0x89   :  { %146 = vst [vmem:[#allocation2] sm:$0xff] %v98_v20 }
  0x8a   :  { %150 = vst [vmem:[#allocation2 + $0x20] sm:$0xff] %v110_v21 }
  0x8c   :  { %v122_v22 = vpop.f32.mrf.mxu2  ;;  %v134_v23 = vpop.f32.mrf.mxu3 }
  0x8d   :  { %154 = vst [vmem:[#allocation2 + $0x40] sm:$0xff] %v122_v22 }
  0x8e   :  { %158 = vst [vmem:[#allocation2 + $0x60] sm:$0xff] %v134_v23 }
  0x90   :  { %v101_v24 = vpop.f32.mrf.mxu0  ;;  %v113_v25 = vpop.f32.mrf.mxu1 }
  0x91   :  { %147 = vst [vmem:[#allocation2 + $0x8] sm:$0xff] %v101_v24 }
  0x92   :  { %151 = vst [vmem:[#allocation2 + $0x28] sm:$0xff] %v113_v25 }
  0x94   :  { %v125_v26 = vpop.f32.mrf.mxu2  ;;  %v137_v27 = vpop.f32.mrf.mxu3 }
  0x95   :  { %155 = vst [vmem:[#allocation2 + $0x48] sm:$0xff] %v125_v26 }
  0x96   :  { %159 = vst [vmem:[#allocation2 + $0x68] sm:$0xff] %v137_v27 }
  0x98   :  { %v104_v28 = vpop.f32.mrf.mxu0  ;;  %v116_v29 = vpop.f32.mrf.mxu1 }
  0x99   :  { %148 = vst [vmem:[#allocation2 + $0x10] sm:$0xff] %v104_v28 }
  0x9a   :  { %152 = vst [vmem:[#allocation2 + $0x30] sm:$0xff] %v116_v29 }
  0x9c   :  { %v128_v30 = vpop.f32.mrf.mxu2  ;;  %v140_v31 = vpop.f32.mrf.mxu3 }
  0x9d   :  { %156 = vst [vmem:[#allocation2 + $0x50] sm:$0xff] %v128_v30 }
  0x9e   :  { %160 = vst [vmem:[#allocation2 + $0x70] sm:$0xff] %v140_v31 }
  0xa0   :  { %v107_v32 = vpop.f32.mrf.mxu0  ;;  %v119_v33 = vpop.f32.mrf.mxu1 }
  0xa1   :  { %149 = vst [vmem:[#allocation2 + $0x18] sm:$0xff] %v107_v32 }
  0xa2   :  { %153 = vst [vmem:[#allocation2 + $0x38] sm:$0xff] %v119_v33 }
  0xa4   :  { %v131_v34 = vpop.f32.mrf.mxu2  ;;  %v143_v35 = vpop.f32.mrf.mxu3 }
  0xa5   :  { %157 = vst [vmem:[#allocation2 + $0x58] sm:$0xff] %v131_v34 }
  0xa6   :  { %161 = vst [vmem:[#allocation2 + $0x78] sm:$0xff] %v143_v35 }
  0xa7   :  { %174 = dma.vmem_to_hbm [thread:$0]  %s167_s20, 2048, %s169_s22, [#allocation3], %s238_s23, %s238_s23, %s239_s24  }
  0xa8   :  { %235 = dma.done.wait [#allocation3], 2048  }
  0xa9   :  { %236 = vsyncadd [#allocation3], 4294965248 }
  0xaa   :  { %179 = vsyncpa [#allocation3], 1 }

</bundles_post_ra>
